<compile_context>
chip_gen: v7x
topology: tpu7x:2x2x1
jax: 0.10.0
libtpu: 0.0.40
codegen_flags: <defaults>
</compile_context>

<pallas_src>
import jax
import jax.numpy as jnp
from jax.experimental import pallas as pl
from jax.experimental.pallas import tpu as pltpu

N_INPUT = 27        # 3*3*3 (one-hot)
N_HIDDEN = 81
N_HIDDEN_PAD = 128  # lane-dense hidden width inside the kernel
N_OUTPUT = 9        # 3*3
DEFAULT_TB = 1024   # batch tile (rows per grid step)


def _round_up(x, m):
    return (x + m - 1) // m * m


# ---------------------------------------------------------------------------
# Reference helpers (pure JAX, used only for initialization / correctness)
# ---------------------------------------------------------------------------
def b9tob27_jax(b9):
    """One-hot encode board values {0, 1, -1} -> 3 channels. [B,9] -> [B,27]."""
    b9 = b9.reshape(-1, 9)
    onehot = jnp.stack(
        [(b9 == 0), (b9 == 1), (b9 == -1)], axis=-1
    ).astype(jnp.float32)  # [B, 9, 3], cell-major like the torch reference
    return onehot.reshape(-1, 27)


def init_params(key):
    """PyTorch-Linear-like init. Weights stored [in, out], biases [1, out]."""
    k1, k2, k3, k4 = jax.random.split(key, 4)
    bound1 = 1.0 / jnp.sqrt(jnp.float32(N_INPUT))
    bound2 = 1.0 / jnp.sqrt(jnp.float32(N_HIDDEN))
    w1 = jax.random.uniform(k1, (N_INPUT, N_HIDDEN), jnp.float32, -bound1, bound1)
    b1 = jax.random.uniform(k2, (1, N_HIDDEN), jnp.float32, -bound1, bound1)
    w2 = jax.random.uniform(k3, (N_HIDDEN, N_OUTPUT), jnp.float32, -bound2, bound2)
    b2 = jax.random.uniform(k4, (1, N_OUTPUT), jnp.float32, -bound2, bound2)
    return w1, b1, w2, b2


def dqn_forward_ref(board, params):
    """Pure-JAX f32 reference (matches the PyTorch module)."""
    x27 = b9tob27_jax(board)
    w1, b1, w2, b2 = params
    h = jax.nn.sigmoid(x27 @ w1 + b1)
    return h @ w2 + b2


# ---------------------------------------------------------------------------
# Kernel-side parameter preprocessing (done once, outside the hot path)
# ---------------------------------------------------------------------------
def prepare_params(params):
    """Permute / pad / cast reference-layout params for the Pallas kernel.

    Reference x27 layout is cell-major (row r = 3*cell + channel). The kernel
    builds the three one-hot channels separately, so w1 is regrouped into
    [3 channels, 9 cells, hidden] and the hidden dim is zero-padded to 128.
    """
    w1, b1, w2, b2 = params
    pad_h = N_HIDDEN_PAD - N_HIDDEN
    w1_ch = w1.reshape(9, 3, N_HIDDEN).transpose(1, 0, 2)         # [3, 9, 81]
    w1_ch = jnp.pad(w1_ch, ((0, 0), (0, 0), (0, pad_h)))          # [3, 9, 128]
    b1_p = jnp.pad(b1, ((0, 0), (0, pad_h)))                      # [1, 128]
    w2_p = jnp.pad(w2, ((0, pad_h), (0, 0)))                      # [128, 9], pad rows == 0
    return (
        w1_ch.astype(jnp.bfloat16),
        b1_p.astype(jnp.float32),
        w2_p.astype(jnp.bfloat16),
        b2.astype(jnp.float32),
    )


# ---------------------------------------------------------------------------
# Pallas kernel
# ---------------------------------------------------------------------------
def dqn_kernel(board_ref, w1_ref, b1_ref, w2_ref, b2_ref, o_ref):
    # board: [TB, 9] int32; w1: [3, 9, 128] bf16; b1: [1, 128] f32;
    # w2: [128, 9] bf16; b2: [1, 9] f32; out: [TB, 9] f32.
    b = board_ref[...]

    # Fused b9tob27: one-hot channels built on the VPU, exact in bf16.
    x0 = (b == 0).astype(jnp.bfloat16)
    x1 = (b == 1).astype(jnp.bfloat16)
    x2 = (b == -1).astype(jnp.bfloat16)

    # fc1: sum of three bf16 MXU matmuls (one per one-hot channel), f32 accum.
    h = jnp.dot(x0, w1_ref[0], preferred_element_type=jnp.float32)
    h += jnp.dot(x1, w1_ref[1], preferred_element_type=jnp.float32)
    h += jnp.dot(x2, w1_ref[2], preferred_element_type=jnp.float32)
    h += b1_ref[...]

    # Sigmoid in f32 (EUP); padded lanes produce 0.5 but hit zero rows of w2.
    s = jax.nn.sigmoid(h)

    # fc2: bf16 MXU matmul, f32 accum + f32 bias.
    y = jnp.dot(s.astype(jnp.bfloat16), w2_ref[...],
                preferred_element_type=jnp.float32)
    y += b2_ref[...]
    o_ref[...] = y.astype(o_ref.dtype)


# ---------------------------------------------------------------------------
# Host wrapper
# ---------------------------------------------------------------------------
def dqn_forward(board, kernel_params, *, tb=DEFAULT_TB):
    """board: [B, 9] (or [9]) array in {-1, 0, 1}. Returns q-values [B, 9] f32."""
    board = jnp.asarray(board, jnp.int32).reshape(-1, 9)
    B = board.shape[0]
    w1, b1, w2, b2 = kernel_params

    # Batch tile: multiple of 8 sublanes, at most `tb`, at least the batch.
    TB = min(_round_up(tb, 8), _round_up(max(B, 1), 8))
    Bp = _round_up(B, TB)
    if Bp != B:
        board = jnp.pad(board, ((0, Bp - B), (0, 0)))  # pad rows encode to "empty"

    grid = (Bp // TB,)
    out = pl.pallas_call(
        dqn_kernel,
        out_shape=jax.ShapeDtypeStruct((Bp, N_OUTPUT), jnp.float32),
        grid_spec=pltpu.PrefetchScalarGridSpec(
            num_scalar_prefetch=0,
            grid=grid,
            in_specs=[
                # Activation stream: new batch tile each grid step.
                pl.BlockSpec((TB, 9), lambda i: (i, 0)),
                # Weights/biases: constant index_map -> VMEM-resident across steps.
                pl.BlockSpec((3, 9, N_HIDDEN_PAD), lambda i: (0, 0, 0)),
                pl.BlockSpec((1, N_HIDDEN_PAD), lambda i: (0, 0)),
                pl.BlockSpec((N_HIDDEN_PAD, N_OUTPUT), lambda i: (0, 0)),
                pl.BlockSpec((1, N_OUTPUT), lambda i: (0, 0)),
            ],
            out_specs=pl.BlockSpec((TB, N_OUTPUT), lambda i: (i, 0)),
        ),
        compiler_params=pltpu.CompilerParams(
            dimension_semantics=("parallel",),  # shard batch tiles across v7x's 2 TCs
        ),
    )(board, w1, b1, w2, b2)
    return out[:B]


if __name__ == "__main__":
    key = jax.random.PRNGKey(0)
    pkey, bkey = jax.random.split(key)

    params = init_params(pkey)           # reference-layout f32 params
    kparams = prepare_params(params)     # kernel-layout (permuted/padded/bf16) params

    # Two example tictactoe boards with values in {-1, 0, 1}.
    batch = 2
    board = jax.random.randint(bkey, (batch, 9), minval=-1, maxval=2).astype(jnp.int32)

    q = dqn_forward(board, kparams)
    q = jax.block_until_ready(q)

    q_ref = dqn_forward_ref(board, params)
    assert q.shape == (batch, N_OUTPUT)
    # bf16 MXU operands => compare against the f32 reference with a bf16-level tolerance.
    assert jnp.allclose(q, q_ref, atol=5e-2, rtol=5e-2), "mismatch vs reference"

    # TODO(synk): choose_action (host-side numpy argmax / epsilon-greedy) is policy
    # glue, not part of the forward pass, so it is intentionally not a kernel.
    print("KERNEL_OK")
</pallas_src>

<mosaic_0001>
module attributes {stable_mosaic.version = 11 : i64} {
  func.func @dqn_kernel(%arg0: i32, %arg1: memref<8x9xi32, #tpu.memory_space<vmem>>, %arg2: memref<3x9x128xbf16, #tpu.memory_space<vmem>>, %arg3: memref<1x128xf32, #tpu.memory_space<vmem>>, %arg4: memref<128x9xbf16, #tpu.memory_space<vmem>>, %arg5: memref<1x9xf32, #tpu.memory_space<vmem>>, %arg6: memref<8x9xf32, #tpu.memory_space<vmem>>) attributes {dimension_semantics = [#tpu.dimension_semantics<parallel>], iteration_bounds = array<i64: 1>, scalar_prefetch = 0 : i64, scratch_operands = 0 : i64, tpu.core_type = #tpu.core_type<tc>, window_params = [{transform_indices = @transform_0, window_bounds = array<i64: 8, 9>}, {pipeline_mode = #tpu.pipeline_mode<synchronous>, transform_indices = @transform_1, window_bounds = array<i64: 3, 9, 128>}, {pipeline_mode = #tpu.pipeline_mode<synchronous>, transform_indices = @transform_2, window_bounds = array<i64: 1, 128>}, {pipeline_mode = #tpu.pipeline_mode<synchronous>, transform_indices = @transform_3, window_bounds = array<i64: 128, 9>}, {pipeline_mode = #tpu.pipeline_mode<synchronous>, transform_indices = @transform_4, window_bounds = array<i64: 1, 9>}, {transform_indices = @transform_5, window_bounds = array<i64: 8, 9>}]} {
    %c0 = arith.constant 0 : index
    %c0_0 = arith.constant 0 : index
    %0 = vector.load %arg1[%c0, %c0_0] : memref<8x9xi32, #tpu.memory_space<vmem>>, vector<8x9xi32>
    %c0_i32 = arith.constant 0 : i32
    %1 = vector.broadcast %c0_i32 : i32 to vector<8x9xi32>
    %2 = arith.cmpi eq, %0, %1 : vector<8x9xi32>
    %3 = arith.extui %2 : vector<8x9xi1> to vector<8x9xi32>
    %4 = arith.sitofp %3 : vector<8x9xi32> to vector<8x9xf32>
    %5 = arith.truncf %4 : vector<8x9xf32> to vector<8x9xbf16>
    %c1_i32 = arith.constant 1 : i32
    %6 = vector.broadcast %c1_i32 : i32 to vector<8x9xi32>
    %7 = arith.cmpi eq, %0, %6 : vector<8x9xi32>
    %8 = arith.extui %7 : vector<8x9xi1> to vector<8x9xi32>
    %9 = arith.sitofp %8 : vector<8x9xi32> to vector<8x9xf32>
    %10 = arith.truncf %9 : vector<8x9xf32> to vector<8x9xbf16>
    %c-1_i32 = arith.constant -1 : i32
    %11 = vector.broadcast %c-1_i32 : i32 to vector<8x9xi32>
    %12 = arith.cmpi eq, %0, %11 : vector<8x9xi32>
    %13 = arith.extui %12 : vector<8x9xi1> to vector<8x9xi32>
    %14 = arith.sitofp %13 : vector<8x9xi32> to vector<8x9xf32>
    %15 = arith.truncf %14 : vector<8x9xf32> to vector<8x9xbf16>
    %c0_1 = arith.constant 0 : index
    %c0_2 = arith.constant 0 : index
    %c0_3 = arith.constant 0 : index
    %16 = vector.load %arg2[%c0_1, %c0_2, %c0_3] : memref<3x9x128xbf16, #tpu.memory_space<vmem>>, vector<1x9x128xbf16>
    %17 = vector.shape_cast %16 : vector<1x9x128xbf16> to vector<9x128xbf16>
    %cst = arith.constant dense<0.000000e+00> : vector<8x128xf32>
    %18 = tpu.matmul %5, %17, %cst {dimension_numbers = #tpu.dot_dimension_numbers<[1], [0], [0], [1], [0, 0, 1, 1], [], []>} : vector<8x9xbf16>, vector<9x128xbf16>, vector<8x128xf32> -> vector<8x128xf32>
    %c1 = arith.constant 1 : index
    %c0_4 = arith.constant 0 : index
    %c0_5 = arith.constant 0 : index
    %19 = vector.load %arg2[%c1, %c0_4, %c0_5] : memref<3x9x128xbf16, #tpu.memory_space<vmem>>, vector<1x9x128xbf16>
    %20 = vector.shape_cast %19 : vector<1x9x128xbf16> to vector<9x128xbf16>
    %cst_6 = arith.constant dense<0.000000e+00> : vector<8x128xf32>
    %21 = tpu.matmul %10, %20, %cst_6 {dimension_numbers = #tpu.dot_dimension_numbers<[1], [0], [0], [1], [0, 0, 1, 1], [], []>} : vector<8x9xbf16>, vector<9x128xbf16>, vector<8x128xf32> -> vector<8x128xf32>
    %22 = arith.addf %18, %21 : vector<8x128xf32>
    %c2 = arith.constant 2 : index
    %c0_7 = arith.constant 0 : index
    %c0_8 = arith.constant 0 : index
    %23 = vector.load %arg2[%c2, %c0_7, %c0_8] : memref<3x9x128xbf16, #tpu.memory_space<vmem>>, vector<1x9x128xbf16>
    %24 = vector.shape_cast %23 : vector<1x9x128xbf16> to vector<9x128xbf16>
    %cst_9 = arith.constant dense<0.000000e+00> : vector<8x128xf32>
    %25 = tpu.matmul %15, %24, %cst_9 {dimension_numbers = #tpu.dot_dimension_numbers<[1], [0], [0], [1], [0, 0, 1, 1], [], []>} : vector<8x9xbf16>, vector<9x128xbf16>, vector<8x128xf32> -> vector<8x128xf32>
    %26 = arith.addf %22, %25 : vector<8x128xf32>
    %c0_10 = arith.constant 0 : index
    %c0_11 = arith.constant 0 : index
    %27 = vector.load %arg3[%c0_10, %c0_11] : memref<1x128xf32, #tpu.memory_space<vmem>>, vector<1x128xf32>
    %28 = vector.broadcast %27 : vector<1x128xf32> to vector<8x128xf32>
    %29 = arith.addf %26, %28 : vector<8x128xf32>
    %30 = arith.negf %29 : vector<8x128xf32>
    %31 = math.exp %30 : vector<8x128xf32>
    %cst_12 = arith.constant 1.000000e+00 : f32
    %32 = vector.broadcast %cst_12 : f32 to vector<8x128xf32>
    %33 = arith.addf %32, %31 : vector<8x128xf32>
    %34 = arith.divf %32, %33 : vector<8x128xf32>
    %35 = arith.truncf %34 : vector<8x128xf32> to vector<8x128xbf16>
    %c0_13 = arith.constant 0 : index
    %c0_14 = arith.constant 0 : index
    %36 = vector.load %arg4[%c0_13, %c0_14] : memref<128x9xbf16, #tpu.memory_space<vmem>>, vector<128x9xbf16>
    %cst_15 = arith.constant dense<0.000000e+00> : vector<8x9xf32>
    %37 = tpu.matmul %35, %36, %cst_15 {dimension_numbers = #tpu.dot_dimension_numbers<[1], [0], [0], [1], [0, 0, 1, 1], [], []>} : vector<8x128xbf16>, vector<128x9xbf16>, vector<8x9xf32> -> vector<8x9xf32>
    %c0_16 = arith.constant 0 : index
    %c0_17 = arith.constant 0 : index
    %38 = vector.load %arg5[%c0_16, %c0_17] : memref<1x9xf32, #tpu.memory_space<vmem>>, vector<1x9xf32>
    %39 = vector.broadcast %38 : vector<1x9xf32> to vector<8x9xf32>
    %40 = arith.addf %37, %39 : vector<8x9xf32>
    %c0_18 = arith.constant 0 : index
    %c0_19 = arith.constant 0 : index
    %41 = vector.load %arg6[%c0_18, %c0_19] : memref<8x9xf32, #tpu.memory_space<vmem>>, vector<8x9xf32>
    tpu.vector_store %arg6[%c0_18, %c0_19], %40 {strides = array<i32>} : memref<8x9xf32, #tpu.memory_space<vmem>>, vector<8x9xf32>,
    return
  }
  func.func @transform_0(%arg0: i32) -> (i32, i32) {
    %c0_i32 = arith.constant 0 : i32
    %c0_i32_0 = arith.constant 0 : i32
    return %arg0, %c0_i32 : i32, i32
  }
  func.func @transform_1(%arg0: i32) -> (i32, i32, i32) {
    %c0_i32 = arith.constant 0 : i32
    %c0_i32_0 = arith.constant 0 : i32
    %c0_i32_1 = arith.constant 0 : i32
    %c0_i32_2 = arith.constant 0 : i32
    return %c0_i32, %c0_i32_0, %c0_i32_1 : i32, i32, i32
  }
  func.func @transform_2(%arg0: i32) -> (i32, i32) {
    %c0_i32 = arith.constant 0 : i32
    %c0_i32_0 = arith.constant 0 : i32
    %c0_i32_1 = arith.constant 0 : i32
    return %c0_i32, %c0_i32_0 : i32, i32
  }
  func.func @transform_3(%arg0: i32) -> (i32, i32) {
    %c0_i32 = arith.constant 0 : i32
    %c0_i32_0 = arith.constant 0 : i32
    %c0_i32_1 = arith.constant 0 : i32
    return %c0_i32, %c0_i32_0 : i32, i32
  }
  func.func @transform_4(%arg0: i32) -> (i32, i32) {
    %c0_i32 = arith.constant 0 : i32
    %c0_i32_0 = arith.constant 0 : i32
    %c0_i32_1 = arith.constant 0 : i32
    return %c0_i32, %c0_i32_0 : i32, i32
  }
  func.func @transform_5(%arg0: i32) -> (i32, i32) {
    %c0_i32 = arith.constant 0 : i32
    %c0_i32_0 = arith.constant 0 : i32
    return %arg0, %c0_i32 : i32, i32
  }
}

</mosaic_0001>

<bundles_post_ra>
// kernel: tpu_custom_call.1
= control target key start
LH: loop header
LB: loop body
LE: loop exit
PB: predicated region body
PF: predicated region fallthrough
CT: control target
= control target key end

     0   :  { %vm49_vm0 = vcmask 1043456   ;;  %v463_v0 = vmov 0.0   ;;  %vm50_vm1 = vcmask 1044480   ;;  %v464_v2 = vmov 65535   ;;  %s559_s0 = inlined_call_operand.vmem [shape: s32[8,9], index: 0, kind: input, shape index: {}]   ;;  %s560_s1 = inlined_call_operand.vmem [shape: bf16[3,9,128], index: 1, kind: input, shape index: {}]   ;;  %s561_s2 = inlined_call_operand.vmem [shape: f32[1,128], index: 2, kind: input, shape index: {}]   ;;  %s562_s3 = inlined_call_operand.vmem [shape: bf16[128,9], index: 3, kind: input, shape index: {}]   ;;  %s563_s4 = inlined_call_operand.vmem [shape: f32[1,9], index: 4, kind: input, shape index: {}]   ;;  %s564_s5 = inlined_call_operand.hbm [shape: f32[8,9], index: 5, kind: output, shape index: {}]  }
   0x1   :  { %382 = vmatprep.subr.bf16.mxu0 %v463_v0  ;;  %v424_v1 = vld [vmem:[%s560_s1 + $0x8] sm:$0x1f]   ;;  %400 = vmatprep.subr.bf16.mxu1 %v463_v0  ;;  %v51_v3 = vsel %vm49_vm0, 4294967295, %v464_v2  ;;  %v425_v4 = vld [vmem:[%s560_s1] sm:$0x1f]   ;;  %vm465_vm2 = vmmov 0  }
   0x2   :  { %v52_v5 = vsel %vm50_vm1, %v51_v3, 0  ;;  %384 = vmatprep.mubr.msk.bf16.mxu0 %vm465_vm2, %v463_v0  ;;  %v22_v6 = vld [vmem:[%s559_s0] sm:$0xff]  ;;  %416 = vmatprep.mubr.msk.bf16.mxu1 %vm465_vm2, %v463_v0  ;;  %vm45_vm4 = vcmask 72704   ;;  %v426_v11 = vld [vmem:[%s560_s1 + $0x10] sm:$0x1f]  }
   0x3   :  { %v54_v7 = vand.u32 %v424_v1, %v52_v5  ;;  %vm27_vm3 = vcmp.eq.s32.totalorder %v22_v6, 1  ;;  %v105_v9 = vand.u32 %v425_v4, %v52_v5  ;;  %vm23_vm5 = vcmp.eq.s32.totalorder %v22_v6, 0 }
   0x4   :  { %v344_v8 = vsel %vm27_vm3, 1.0, %v463_v0  ;;  %v343_v12 = vsel %vm23_vm5, 1.0, %v463_v0 }
   0x5   :  { %383 = vmatpush3.bf16.msra.mxu0 %v54_v7  ;;  %v30_v10 = vpack.c.bf16 %v344_v8, %v344_v8 }
   0x6   :  { %388 = vmatprep.subr.bf16.mxu0 %v463_v0 }
   0x8   :  { %385 = vmatmul.mubr.msk.bf16.vlgmr.msra.gmra.mrb[0].mxu0 %vm45_vm4, %v30_v10 }
   0x9   :  { %389 = vmatpush3.bf16.msra.mxu0 %v105_v9  ;;  %390 = vmatprep.mubr.msk.bf16.mxu0 %vm465_vm2, %v463_v0 }
   0xa   :  { %10 = vsyncpa [#allocation3], 0  ;;  %394 = vmatprep.subr.bf16.mxu0 %v463_v0  ;;  %v26_v13 = vpack.c.bf16 %v343_v12, %v343_v12  ;;  %v159_v14 = vand.u32 %v426_v11, %v52_v5  ;;  %vm31_vm6 = vcmp.eq.s32.totalorder %v22_v6, 4294967295  ;;  %v427_v17 = vld [vmem:[%s562_s3] sm:$0xff]   ;;  %v428_v18 = vld [vmem:[%s562_s3 + $0x8] sm:$0xff]   ;;  %s466_s18 = smov [#allocation2]  }
   0xb   :  { %v345_v15 = vsel %vm31_vm6, 1.0, %v463_v0  ;;  %401 = vmatpush3.bf16.msra.mxu1 %v427_v17  ;;  %v429_v19 = vld [vmem:[%s562_s3 + $0x10] sm:$0xff]   ;;  %v430_v20 = vld [vmem:[%s562_s3 + $0x18] sm:$0xff]   ;;  %v431_v21 = vld [vmem:[%s562_s3 + $0x20] sm:$0xff]   ;;  %s335_s19 = sshll.u32 %s466_s18, 4  ;;  %s336_s19 = int_to_ptr.vmem [resolvable:$true] %s335_s19 }
   0xc   :  { %v34_v16 = vpack.c.bf16 %v345_v15, %v345_v15  ;;  %402 = vmatprep.subr.bf16.mxu1 %v463_v0  ;;  %v432_v22 = vld [vmem:[%s562_s3 + $0x28] sm:$0xff]   ;;  %v433_v23 = vld [vmem:[%s562_s3 + $0x30] sm:$0xff]   ;;  %v434_v24 = vld [vmem:[%s562_s3 + $0x38] sm:$0xff]   ;;  %p444_p1 = scmp.lt.s32.totalorder %s336_s19, %s336_s19 }
   0xd   :  { %v356_v35 = vld [vmem:[%s561_s2] ss:$0 sm:$0xff]  ;;  %s439_s2 = scalar_lea.vmem %s336_s19, 128 }
   0xe   :  { %v358_v46 = vld [vmem:[%s563_s4] ss:$0 sm:$0xff]  ;;  %p440_p0 = scmp.ne.s32.totalorder %s336_s19, %s439_s2  ;;  %p445_p2 = scmp.lt.s32.totalorder %s439_s2, %s439_s2 }
   0xf   :  { %403 = vmatpush3.bf16.msra.mxu1 %v428_v18 }
  0x10   :  { %391 = vmatmul.mubr.msk.bf16.vlgmr.msra.gmra.mrb[4].mxu0 %vm45_vm4, %v26_v13  ;;  %404 = vmatprep.subr.bf16.mxu1 %v463_v0  ;;  %p446_p3 = por %p445_p2, %p444_p1 }
  0x11   :  { %395 = vmatpush3.bf16.msra.mxu0 %v159_v14  ;;  %396 = vmatprep.mubr.msk.bf16.mxu0 %vm465_vm2, %v463_v0 }
  0x12   :  { %p447_p4 = pnand %p446_p3, %p440_p0 }
  0x13   :  { %405 = vmatpush3.bf16.msra.mxu1 %v429_v19 }
  0x14   :  { %406 = vmatprep.subr.bf16.mxu1 %v463_v0 }
  0x17   :  { %407 = vmatpush3.bf16.msra.mxu1 %v430_v20 }
  0x18   :  { %397 = vmatmul.mubr.msk.bf16.vlgmr.msra.gmra.mrb[8].mxu0 %vm45_vm4, %v34_v16  ;;  %408 = vmatprep.subr.bf16.mxu1 %v463_v0 }
  0x1b   :  { %409 = vmatpush3.bf16.msra.mxu1 %v431_v21 }
  0x1c   :  { %410 = vmatprep.subr.bf16.mxu1 %v463_v0 }
  0x1f   :  { %411 = vmatpush3.bf16.msra.mxu1 %v432_v22 }
  0x20   :  { %412 = vmatprep.subr.bf16.mxu1 %v463_v0 }
  0x23   :  { %413 = vmatpush3.bf16.msra.mxu1 %v433_v23 }
  0x24   :  { %414 = vmatprep.subr.bf16.mxu1 %v463_v0 }
  0x27   :  { %415 = vmatpush3.bf16.msra.mxu1 %v434_v24 }
  0xdb   :  { %v90_v25 = vpop.f32.mrb[0].mxu0 }
  0xdc   :  { %v386_v26 = vpop.f32.mrb[1].mxu0 }
  0xdd   :  { %v93_v27 = vpop.f32.mrb[2].mxu0 }
  0xde   :  { %v387_v28 = vpop.f32.mrb[3].mxu0 }
  0xe3   :  { %v141_v29 = vpop.f32.mrb[4].mxu0 }
  0xe4   :  { %v142_v30 = vadd.f32 %v141_v29, %v90_v25  ;;  %v392_v31 = vpop.f32.mrb[5].mxu0 }
  0xe5   :  { %v144_v32 = vpop.f32.mrb[6].mxu0 }
  0xe6   :  { %v393_v33 = vpop.f32.mrb[7].mxu0 }
  0xeb   :  { %v195_v34 = vpop.f32.mrb[8].mxu0 }
  0xec   :  { %v201_v36 = vadd.f32 %v195_v34, %v142_v30  ;;  %v398_v37 = vpop.f32.mrb[9].mxu0 }
  0xed   :  { %v198_v38 = vpop.f32.mrb[10].mxu0 }
  0xee   :  { %v209_v39 = vadd.f32 %v356_v35, %v201_v36  ;;  %v399_v40 = vpop.f32.mrb[11].mxu0 }
  0xf0   :  { %v357_v41 = vmul.f32 -1.442695, %v209_v39 }
  0xf2   :  { %435 = vpow2.f32 %v357_v41 }
  0xfc   :  { %v436_v42 = vpop.eup %435 }
  0xfd   :  { %v213_v43 = vadd.f32 1.0, %v436_v42 }
  0xff   :  { %437 = vrcp.f32 %v213_v43 }
 0x109   :  { %v438_v44 = vpop.eup %437 }
 0x10a   :  { %v216_v45 = vpack.c.bf16 %v438_v44, %v438_v44 }
 0x10c   :  { %417 = vmatmul.mubr.bf16.vlgmr.msra.gmra.mrb[0].mxu1 %v216_v45 }
 0x1df   :  { %v322_v47 = vpop.f32.mrb[0].mxu1 }
 0x1e0   :  { %v323_v48 = vadd.f32 %v358_v46, %v322_v47  ;;  %v418_v49 = vpop.f32.mrb[1].mxu1 }
 0x1e1   :  { %v325_v50 = vpop.f32.mrb[2].mxu1 }
 0x1e2   :  { %328 = vst.msk [vmem:[#allocation2] sm:$0xff] %vm45_vm4, %v323_v48  ;;  %v419_v51 = vpop.f32.mrb[3].mxu1 }
 0x1e3   :  { %450 = shalt.err (!%p447_p4)
}
 0x1e4   :  { %s451_s4 = scalar_lea.hbm %s564_s5, 128 }
 0x1e5   :  { %p452_p5 = scmp.ne.s32.totalorder %s564_s5, %s451_s4  ;;  %p455_p6 = scmp.lt.u32.totalorder %s451_s4, %s564_s5 }
 0x1e7   :  { %p457_p7 = pnand %p455_p6, %p452_p5 }
 0x1e9   :  { %460 = shalt.err (!%p457_p7)
}
 0x1ea   :  { %338 = dma.vmem_to_hbm [thread:$0]  %s336_s19, 128, %s564_s5, [#allocation3]  }
 0x1eb   :  { %461 = dma.done.wait [#allocation3], 128  }
 0x1ec   :  { %462 = vsyncadd [#allocation3], 4294967168 }
 0x1ed   :  { %342 = vsyncpa [#allocation3], 1 }

</bundles_post_ra>
